<compile_context>
chip_gen: v6e
topology: v6e:2x2x1
jax: 0.10.0
libtpu: 0.0.40
codegen_flags: <defaults>
</compile_context>

<pallas_src>
import jax
import jax.numpy as jnp
from jax.experimental import pallas as pl
from jax.experimental.pallas import tpu as pltpu


# ----------------------------- Pallas kernel ------------------------------- #

def _pool_warp_kernel(xf_ref, pool_ref, w_ref, o_ref, pooled_ref):
    """Adaptive-avg-pool + one 128-lane column block of warped output copies.

    xf_ref:     (C, H*W)   source image (VMEM-resident across its col blocks)
    pool_ref:   (H*W, S2)  shared pooling matrix (same block index every step)
    w_ref:      (S2, COL)  per-source column block of warp matrices
    o_ref:      (C, COL)   output column block
    pooled_ref: (C, S2)    VMEM scratch, reused across column blocks
    """
    # Pool only once per source (first column block); reuse from scratch after.
    @pl.when(pl.program_id(1) == 0)
    def _():
        pooled_ref[...] = jnp.dot(xf_ref[...], pool_ref[...],
                                  preferred_element_type=jnp.float32)

    o_ref[...] = jnp.dot(pooled_ref[...], w_ref[...],
                         preferred_element_type=jnp.float32)


# ------------------------------ glue / setup ------------------------------- #

def adaptive_pool_matrix(in_size, out_size):
    """Row-averaging matrix reproducing torch AdaptiveAvgPool2d bin edges."""
    i = jnp.arange(out_size)[:, None]
    j = jnp.arange(in_size)[None, :]
    start = (i * in_size) // out_size
    end = ((i + 1) * in_size + out_size - 1) // out_size  # ceil
    mask = (j >= start) & (j < end)
    counts = (end - start).astype(jnp.float32)
    return mask.astype(jnp.float32) / counts               # (out, in)


def build_pool_matrix(in_h, in_w, size):
    """(H*W, S*S) matrix: x_flat @ pool_t == flattened adaptive-avg-pool."""
    p_h = adaptive_pool_matrix(in_h, size)                  # (S, H)
    p_w = adaptive_pool_matrix(in_w, size)                  # (S, W)
    return jnp.kron(p_h, p_w).T                             # (H*W, S*S)


def _homography_from_points(src, dst):
    """3x3 homography mapping 4 src points (x, y) to 4 dst points."""
    sx, sy = src[:, 0], src[:, 1]
    dx, dy = dst[:, 0], dst[:, 1]
    zeros, ones = jnp.zeros_like(sx), jnp.ones_like(sx)
    ax = jnp.stack([sx, sy, ones, zeros, zeros, zeros, -sx * dx, -sy * dx], axis=1)
    ay = jnp.stack([zeros, zeros, zeros, sx, sy, ones, -sx * dy, -sy * dy], axis=1)
    a = jnp.concatenate([ax, ay], axis=0)                   # (8, 8)
    b = jnp.concatenate([dx, dy], axis=0)                   # (8,)
    h = jnp.linalg.solve(a, b)
    return jnp.concatenate([h, jnp.ones((1,), h.dtype)]).reshape(3, 3)


def _sample_warp_matrix(key, size, p):
    """(S*S, S*S) bilinear resampling matrix for random affine+perspective,
    border padding (coordinate clamp). Row = dst pixel, column = src pixel."""
    s = size
    k1, k2, k3, k4, k5 = jax.random.split(key, 5)

    # RandomAffine(degrees=15, translate=0.1, p=p)
    apply_aff = jax.random.bernoulli(k1, p)
    angle = jax.random.uniform(k2, (), minval=-15.0, maxval=15.0) * jnp.pi / 180.0
    trans = jax.random.uniform(k3, (2,), minval=-0.1, maxval=0.1) * s
    cx = cy = (s - 1) / 2.0
    ca, sa = jnp.cos(angle), jnp.sin(angle)
    aff = jnp.array([[1.0, 0.0, 0.0], [0.0, 1.0, 0.0], [0.0, 0.0, 1.0]])
    aff = aff.at[0].set(jnp.stack([ca, -sa, cx - ca * cx + sa * cy + trans[0]]))
    aff = aff.at[1].set(jnp.stack([sa, ca, cy - sa * cx - ca * cy + trans[1]]))
    aff = jnp.where(apply_aff, aff, jnp.eye(3))

    # RandomPerspective(0.7, p=p): corners pulled inward by U(0, 0.7)*half
    apply_persp = jax.random.bernoulli(k4, p)
    corners = jnp.array([[0.0, 0.0], [s - 1.0, 0.0], [s - 1.0, s - 1.0], [0.0, s - 1.0]])
    signs = jnp.array([[1.0, 1.0], [-1.0, 1.0], [-1.0, -1.0], [1.0, -1.0]])
    factors = jax.random.uniform(k5, (4, 2), minval=0.0, maxval=0.7)
    dst_corners = corners + signs * factors * ((s - 1) / 2.0)
    persp = _homography_from_points(corners, dst_corners)
    persp = jnp.where(apply_persp, persp, jnp.eye(3))

    fwd = persp @ aff                 # src -> dst
    inv = jnp.linalg.inv(fwd)         # dst -> src (inverse warp for sampling)

    ys, xs = jnp.meshgrid(jnp.arange(s, dtype=jnp.float32),
                          jnp.arange(s, dtype=jnp.float32), indexing="ij")
    dst = jnp.stack([xs.ravel(), ys.ravel(), jnp.ones(s * s, jnp.float32)], axis=0)
    src = inv @ dst
    sx = jnp.clip(src[0] / src[2], 0.0, s - 1.0)   # border padding
    sy = jnp.clip(src[1] / src[2], 0.0, s - 1.0)
    x0 = jnp.floor(sx)
    y0 = jnp.floor(sy)
    x1 = jnp.minimum(x0 + 1.0, s - 1.0)
    y1 = jnp.minimum(y0 + 1.0, s - 1.0)
    wx, wy = sx - x0, sy - y0
    x0i, x1i = x0.astype(jnp.int32), x1.astype(jnp.int32)
    y0i, y1i = y0.astype(jnp.int32), y1.astype(jnp.int32)

    s2 = s * s
    iota = jnp.arange(s2, dtype=jnp.int32)[None, :]

    def onehot(idx):
        return (idx[:, None] == iota).astype(jnp.float32)

    m = (((1.0 - wx) * (1.0 - wy))[:, None] * onehot(y0i * s + x0i)
         + (wx * (1.0 - wy))[:, None] * onehot(y0i * s + x1i)
         + ((1.0 - wx) * wy)[:, None] * onehot(y1i * s + x0i)
         + (wx * wy)[:, None] * onehot(y1i * s + x1i))
    return m                                       # (S2, S2)


def build_warp_blocks(key, n_src, n_aug_copies, size, p, pad_to):
    """(N, S2, pad_to) per-source warp column blocks for the second matmul.

    Column block a of source i maps its pooled image to output sample a*N + i:
    a = 0 -> identity (the non-augmented copy the reference keeps), a >= 1 ->
    random affine+perspective.  Columns beyond A*S2 are zero padding (sliced
    off by the wrapper).
    """
    s2 = size * size
    a_total = 1 + n_aug_copies
    eye = jnp.broadcast_to(jnp.eye(s2, dtype=jnp.float32), (1, n_src, s2, s2))
    if n_aug_copies > 0:
        keys = jax.random.split(key, n_src * n_aug_copies)
        rand = jax.vmap(lambda k: _sample_warp_matrix(k, size, p))(keys)
        # torch.tile order: augmented sample j -> source j % N, copy 1 + j // N
        rand = rand.reshape(n_aug_copies, n_src, s2, s2)
        warps = jnp.concatenate([eye, rand], axis=0)           # (A, N, S2, S2)
    else:
        warps = eye

    # out[c, a*S2 + t] = sum_s pooled[c, s] * warps[a, n, t, s]
    blocks = jnp.transpose(warps, (1, 3, 0, 2))                # (N, S2, A, S2)
    blocks = blocks.reshape(n_src, s2, a_total * s2)
    pad = pad_to - a_total * s2
    if pad > 0:
        blocks = jnp.pad(blocks, ((0, 0), (0, 0), (0, pad)))
    return blocks                                              # (N, S2, pad_to)


# ----------------------------- pallas wrapper ------------------------------ #

def fused_pool_warp_pallas(x_flat, pool_t, w_blocks, col_block=128):
    n, c, hw = x_flat.shape
    _, s2 = pool_t.shape
    _, _, as2_pad = w_blocks.shape
    assert as2_pad % col_block == 0
    n_col = as2_pad // col_block

    # Scheduling hint so XLA overlaps the host-side warp-matrix construction
    # with the custom call.
    flops = 2 * n * c * (hw * s2 + s2 * as2_pad)
    bytes_accessed = 4 * (x_flat.size + pool_t.size + w_blocks.size + n * c * as2_pad)

    # Explicit VMEM budget (v5e default scoped is only 16 MiB): double-buffered
    # in/out tiles + pooled scratch, with generous headroom.
    tile_bytes = 4 * (c * hw + hw * s2 + s2 * col_block + c * col_block + c * s2)
    vmem_limit = min(32 * 1024 * 1024, max(2 * 1024 * 1024, 4 * tile_bytes))

    return pl.pallas_call(
        _pool_warp_kernel,
        out_shape=jax.ShapeDtypeStruct((n, c, as2_pad), jnp.float32),
        grid=(n, n_col),
        in_specs=[
            # source image: VMEM-resident across all of its column blocks
            pl.BlockSpec((None, c, hw), lambda i, j: (i, 0, 0)),
            # shared pool matrix: same block index every step -> DMA'd once
            pl.BlockSpec((hw, s2), lambda i, j: (0, 0)),
            # per-source warp columns, tiled into 128-lane blocks
            pl.BlockSpec((None, s2, col_block), lambda i, j: (i, 0, j)),
        ],
        out_specs=pl.BlockSpec((None, c, col_block), lambda i, j: (i, 0, j)),
        scratch_shapes=[pltpu.VMEM((c, s2), jnp.float32)],
        compiler_params=pltpu.CompilerParams(
            # batch axis sharded across v7x's two TensorCores; column axis is
            # sequential so the pooled scratch written at j==0 is reused.
            dimension_semantics=("parallel", "arbitrary"),
            vmem_limit_bytes=vmem_limit,
        ),
        cost_estimate=pl.CostEstimate(
            flops=flops, transcendentals=0, bytes_accessed=bytes_accessed),
    )(x_flat, pool_t, w_blocks)


def image_augmentations(x, output_size, augmentations_number, key, p=0.7):
    """Forward pass of ImageAugmentations. Returns (N*A, C, S, S)."""
    n, c, h, w = x.shape
    s = output_size
    a = augmentations_number
    s2 = s * s
    as2 = a * s2
    as2_pad = ((as2 + 127) // 128) * 128   # lane-dense stores + clean MXU tile

    # Lane-dense input layout: H*W sits in the last dim. Keep f32 so the
    # identity-pool check stays tight (bf16 W would halve DMA bytes if the
    # tolerance were relaxed).
    x_flat = x.astype(jnp.float32).reshape(n, c, h * w)

    pool_t = build_pool_matrix(h, w, s)                           # (H*W, S2)
    w_blocks = build_warp_blocks(key, n, a - 1, s, p, as2_pad)    # (N, S2, AS2_pad)

    out = fused_pool_warp_pallas(x_flat, pool_t, w_blocks)        # (N, C, AS2_pad)
    out = out[:, :, :as2]                                         # drop lane padding

    # column block a of source i is output sample a*N + i (torch.tile ordering)
    out = out.reshape(n, c, a, s, s)
    out = jnp.transpose(out, (2, 0, 1, 3, 4)).reshape(n * a, c, s, s)
    return out


# ---------------------------------- main ----------------------------------- #

if __name__ == "__main__":
    key = jax.random.PRNGKey(0)
    kx, kaug = jax.random.split(key)

    N, C, H, W = 2, 4, 16, 16
    OUTPUT_SIZE, AUG_NUM = 8, 3

    x = jax.random.normal(kx, (N, C, H, W), dtype=jnp.float32)

    out = image_augmentations(x, OUTPUT_SIZE, AUG_NUM, kaug, p=0.7)
    out = jax.block_until_ready(out)

    assert out.shape == (N * AUG_NUM, C, OUTPUT_SIZE, OUTPUT_SIZE), out.shape

    # First N samples must equal the plain adaptive-avg-pooled images.
    ref = x.reshape(N, C, OUTPUT_SIZE, H // OUTPUT_SIZE,
                    OUTPUT_SIZE, W // OUTPUT_SIZE).mean(axis=(3, 5))
    assert jnp.allclose(out[:N], ref, atol=1e-5)
    assert bool(jnp.all(jnp.isfinite(out)))

    print("KERNEL_OK")
</pallas_src>

<mosaic_0001>
module attributes {stable_mosaic.version = 11 : i64} {
  func.func @_pool_warp_kernel(%arg0: i32, %arg1: i32, %arg2: memref<1x4x256xf32, #tpu.memory_space<vmem>>, %arg3: memref<256x64xf32, #tpu.memory_space<vmem>>, %arg4: memref<1x64x128xf32, #tpu.memory_space<vmem>>, %arg5: memref<1x4x128xf32, #tpu.memory_space<vmem>>, %arg6: memref<4x64xf32, #tpu.memory_space<vmem>>) attributes {dimension_semantics = [#tpu.dimension_semantics<parallel>, #tpu.dimension_semantics<arbitrary>], iteration_bounds = array<i64: 2, 2>, scalar_prefetch = 0 : i64, scratch_operands = 1 : i64, tpu.core_type = #tpu.core_type<tc>, window_params = [{transform_indices = @transform_0, window_bounds = array<i64: 1, 4, 256>}, {pipeline_mode = #tpu.pipeline_mode<synchronous>, transform_indices = @transform_1, window_bounds = array<i64: 256, 64>}, {transform_indices = @transform_2, window_bounds = array<i64: 1, 64, 128>}, {transform_indices = @transform_3, window_bounds = array<i64: 1, 4, 128>}]} {
    %c0_i32 = arith.constant 0 : i32
    %0 = arith.cmpi eq, %arg1, %c0_i32 : i32
    %1 = arith.extui %0 : i1 to i32
    %c0_i32_0 = arith.constant 0 : i32
    %2 = arith.cmpi ne, %1, %c0_i32_0 : i32
    scf.if %2 {
      %c0_8 = arith.constant 0 : index
      %c0_9 = arith.constant 0 : index
      %c0_10 = arith.constant 0 : index
      %10 = vector.load %arg2[%c0_8, %c0_9, %c0_10] : memref<1x4x256xf32, #tpu.memory_space<vmem>>, vector<1x4x256xf32>
      %11 = vector.shape_cast %10 : vector<1x4x256xf32> to vector<4x256xf32>
      %c0_11 = arith.constant 0 : index
      %c0_12 = arith.constant 0 : index
      %12 = vector.load %arg3[%c0_11, %c0_12] : memref<256x64xf32, #tpu.memory_space<vmem>>, vector<256x64xf32>
      %cst_13 = arith.constant dense<0.000000e+00> : vector<4x64xf32>
      %13 = tpu.matmul %11, %12, %cst_13 {dimension_numbers = #tpu.dot_dimension_numbers<[1], [0], [0], [1], [0, 0, 1, 1], [], []>} : vector<4x256xf32>, vector<256x64xf32>, vector<4x64xf32> -> vector<4x64xf32>
      %c0_14 = arith.constant 0 : index
      %c0_15 = arith.constant 0 : index
      %14 = vector.load %arg6[%c0_14, %c0_15] : memref<4x64xf32, #tpu.memory_space<vmem>>, vector<4x64xf32>
      tpu.vector_store %arg6[%c0_14, %c0_15], %13 {strides = array<i32>} : memref<4x64xf32, #tpu.memory_space<vmem>>, vector<4x64xf32>,
    } else {
    }
    %c0 = arith.constant 0 : index
    %c0_1 = arith.constant 0 : index
    %3 = vector.load %arg6[%c0, %c0_1] : memref<4x64xf32, #tpu.memory_space<vmem>>, vector<4x64xf32>
    %c0_2 = arith.constant 0 : index
    %c0_3 = arith.constant 0 : index
    %c0_4 = arith.constant 0 : index
    %4 = vector.load %arg4[%c0_2, %c0_3, %c0_4] : memref<1x64x128xf32, #tpu.memory_space<vmem>>, vector<1x64x128xf32>
    %5 = vector.shape_cast %4 : vector<1x64x128xf32> to vector<64x128xf32>
    %cst = arith.constant dense<0.000000e+00> : vector<4x128xf32>
    %6 = tpu.matmul %3, %5, %cst {dimension_numbers = #tpu.dot_dimension_numbers<[1], [0], [0], [1], [0, 0, 1, 1], [], []>} : vector<4x64xf32>, vector<64x128xf32>, vector<4x128xf32> -> vector<4x128xf32>
    %c0_5 = arith.constant 0 : index
    %c0_6 = arith.constant 0 : index
    %c0_7 = arith.constant 0 : index
    %7 = vector.load %arg5[%c0_5, %c0_6, %c0_7] : memref<1x4x128xf32, #tpu.memory_space<vmem>>, vector<1x4x128xf32>
    %8 = vector.shape_cast %7 : vector<1x4x128xf32> to vector<4x128xf32>
    %9 = vector.shape_cast %6 : vector<4x128xf32> to vector<1x4x128xf32>
    tpu.vector_store %arg5[%c0_5, %c0_6, %c0_7], %9 {strides = array<i32>} : memref<1x4x128xf32, #tpu.memory_space<vmem>>, vector<1x4x128xf32>,
    return
  }
  func.func @transform_0(%arg0: i32, %arg1: i32) -> (i32, i32, i32) {
    %c0_i32 = arith.constant 0 : i32
    %c0_i32_0 = arith.constant 0 : i32
    %c0_i32_1 = arith.constant 0 : i32
    return %arg0, %c0_i32, %c0_i32_0 : i32, i32, i32
  }
  func.func @transform_1(%arg0: i32, %arg1: i32) -> (i32, i32) {
    %c0_i32 = arith.constant 0 : i32
    %c0_i32_0 = arith.constant 0 : i32
    %c0_i32_1 = arith.constant 0 : i32
    return %c0_i32, %c0_i32_0 : i32, i32
  }
  func.func @transform_2(%arg0: i32, %arg1: i32) -> (i32, i32, i32) {
    %c0_i32 = arith.constant 0 : i32
    %c0_i32_0 = arith.constant 0 : i32
    return %arg0, %c0_i32, %arg1 : i32, i32, i32
  }
  func.func @transform_3(%arg0: i32, %arg1: i32) -> (i32, i32, i32) {
    %c0_i32 = arith.constant 0 : i32
    %c0_i32_0 = arith.constant 0 : i32
    return %arg0, %c0_i32, %arg1 : i32, i32, i32
  }
}

</mosaic_0001>

<bundles_post_ra>
// kernel: tpu_custom_call.1
= control target key start
LH: loop header
LB: loop body
LE: loop exit
PB: predicated region body
PF: predicated region fallthrough
CT: control target
= control target key end

     0   :  { %s1112_s0 = inlined_call_operand.vmem [shape: f32[2,4,256], index: 0, kind: input, shape index: {}]   ;;  %s1113_s1 = inlined_call_operand.vmem [shape: f32[256,64], index: 1, kind: input, shape index: {}]   ;;  %s1114_s2 = inlined_call_operand.vmem [shape: f32[2,64,256], index: 2, kind: input, shape index: {}]   ;;  %s1115_s3 = inlined_call_operand.hbm [shape: f32[2,4,256], index: 3, kind: output, shape index: {}]  }
   0x1   :  { %1116 = sst [smem:[#allocation7_spill]] %s1114_s2 }
   0x2   :  { %8 = vsyncpa [#allocation5], 0 }
   0x3   :  { %10 = vsyncpa [#allocation5 + $0x1], 0  ;;  %s848_s12 = smov 0   ;;  %s850_s13 = smov 0  }
   0x4   :  { %s852_s14 = smov 0   ;;  %s854_s15 = smov 0  }
   0x5   :  { %s856_s16 = smov 0   ;;  %s858_s17 = smov 0  }
   0x6   :  { %s860_s18 = smov 0   ;;  %s862_s19 = smov 0  }
   0x7 LB: > { %s574_s20 = sadd.s32 4294967295, %s823_s19   ;;  %s575_s21 = sadd.s32 4294967294, %s823_s19   ;;  %s823_s19 = sphi %s862_s19, %s16_s19   ;;  %s819_s18 = sphi %s860_s18, %s1127_s18   ;;  %s815_s17 = sphi %s858_s17, %s1126_s17   ;;  %s811_s16 = sphi %s856_s16, %s1125_s16   ;;  %s807_s15 = sphi %s854_s15, %s1124_s15   ;;  %s803_s14 = sphi %s852_s14, %s1123_s14   ;;  %s799_s13 = sphi %s850_s13, %s1122_s13   ;;  %s795_s12 = sphi %s848_s12, %s1121_s12  }
   0x8   : > { %s25_s22 = sadd.s32 1, %s815_s17  ;;  %s28_s23 = sadd.s32 1, %s819_s18 }
   0x9   : > { %p26_p0 = scmp.ge.s32.totalorder %s25_s22, 2  ;;  %p91_p1 = scmp.ne.s32.totalorder %s803_s14, %s799_s13 }
   0xa   : > { %p92_p2 = scmp.eq.s32.totalorder %s823_s19, 0  ;;  %p123_p5 = scmp.eq.s32.totalorder %s574_s20, 3 }
   0xb   : > { %s1129_s22 = smov (%p26_p0, %s25_s22), 0  ;;  %s1131_s23 = smov (!%p26_p0, %s28_s23), %s819_s18 }
   0xc   : > { %s80_s24 = ssub.s32 %s815_s17, %s1129_s22  ;;  %p900_p3 = por %p92_p2, %p91_p1 }
   0xd   : > { %p30_p4 = scmp.ge.s32.totalorder %s1131_s23, 2  ;;  %p128_p6 = scmp.ne.s32.totalorder %s799_s13, %s795_s12 }
   0xe   : > { %p129_p7 = scmp.eq.s32.totalorder %s575_s21, 3  ;;  %p908_p8 = por %p123_p5, %p91_p1 }
   0xf   : > { %s1133_s23 = smov (%p30_p4, %s1131_s23), 0  ;;  %s84_s30 = sadd.s32 1, %s803_s14 }
  0x10   : > { %p912_p9 = por %p129_p7, %p128_p6  ;;  %s79_s28 = ssub.s32 %s819_s18, %s1133_s23 }
  0x11   : > { %s81_s29 = sor.u32 %s80_s24, %s79_s28  ;;  %p577_p11 = scmp.ge.s32.totalorder %s823_s19, 4 }
  0x12   : > { %p82_p10 = scmp.eq.s32.totalorder %s81_s29, 0 }
  0x13   : > { %148 = sbr.rel (%p577_p11) target bundleno = 38 (0x26), region = 20 }
  0x14   : > { %s920_s4 = scalar_select %p82_p10, %s803_s14, %s84_s30  }
  0x18   : > { %159 = sbr.rel (!%p900_p3) target bundleno = 38 (0x26), region = 28  ;;  %s161_s5 = sand.u32 (%p900_p3), 1, %s803_s14  }
  0x19   : > { %s579_s6 = sshll.u32 (%p900_p3), %s819_s18, 4  ;;  %s578_s7 = sshll.u32 (%p900_p3), %s161_s5, 6 }
  0x1a   : > { %s165_s8 = sadd.s32 (%p900_p3), %s815_s17, %s579_s6  ;;  %s1120_s2 = sld [smem:[#allocation7_spill]] (%p900_p3) }
  0x1b   : > { %s580_s9 = sshll.u32 (%p900_p3), %s165_s8, 3  ;;  %s163_s21 = scalar_lea.vmem (%p900_p3), [#allocation3], %s578_s7 }
  0x20   : > { %s167_s20 = scalar_lea.vmem %s1120_s2, %s580_s9 }
  0x21   : > { %v210_v0 = vld [vmem:[%s167_s20] sm:$0xff]  ;;  %v212_v1 = vld [vmem:[%s167_s20 + $0x10] sm:$0xff] }
  0x22   : > { %v214_v2 = vld [vmem:[%s167_s20 + $0x20] sm:$0xff]  ;;  %211 = vst [vmem:[%s163_s21] sm:$0xff] %v210_v0  ;;  %213 = vst [vmem:[%s163_s21 + $0x8] sm:$0xff] %v212_v1  ;;  %v216_v3 = vld [vmem:[%s167_s20 + $0x30] sm:$0xff] }
  0x23   : > { %215 = vst [vmem:[%s163_s21 + $0x10] sm:$0xff] %v214_v2  ;;  %v218_v4 = vld [vmem:[%s167_s20 + $0x40] sm:$0xff]  ;;  %v220_v5 = vld [vmem:[%s167_s20 + $0x50] sm:$0xff]  ;;  %217 = vst [vmem:[%s163_s21 + $0x18] sm:$0xff] %v216_v3 }
  0x24   : > { %219 = vst [vmem:[%s163_s21 + $0x20] sm:$0xff] %v218_v4  ;;  %221 = vst [vmem:[%s163_s21 + $0x28] sm:$0xff] %v220_v5  ;;  %v222_v6 = vld [vmem:[%s167_s20 + $0x60] sm:$0xff]  ;;  %v224_v7 = vld [vmem:[%s167_s20 + $0x70] sm:$0xff] }
  0x25   : > { %223 = vst [vmem:[%s163_s21 + $0x30] sm:$0xff] %v222_v6  ;;  %225 = vst [vmem:[%s163_s21 + $0x38] sm:$0xff] %v224_v7 }
  0x26 PF: > { %p581_p12 = scmp.ge.s32.totalorder %s823_s19, 1  ;;  %p230_p13 = scmp.lt.s32.totalorder %s823_s19, 5 }
  0x28   : > { %p231_p0 = pnand %p581_p12, %p230_p13 }
  0x29   : > { %s934_s24 = sand.u32 (!%p231_p0), 1, %s799_s13   ;;  %p265_p1 = scmp.lt.s32.totalorder (!%p231_p0), %s811_s16, 1 }
  0x2a   : > { %234 = sbr.rel (%p231_p0) target bundleno = 508 (0x1fc), region = 66  ;;  %s582_s25 = sshll.u32 (!%p231_p0), %s934_s24, 6 }
  0x2b   : > { %s583_s28 = sshll.u32 (!%p231_p0), %s934_s24, 2  ;;  %s943_s8 = scalar_lea.vmem (!%p231_p0), [#allocation3], %s582_s25 }
  0x2c   : > { %s945_s9 = scalar_lea.vmem (!%p231_p0), [#allocation4], %s583_s28  ;;  %p586_p2 = scmp.ne.s32.totalorder (!%p231_p0), %s807_s15, 0 }
  0x2f   : > { %s266_s29 = scalar_select %p265_p1, %s811_s16, 1 }
  0x30   : > { %273 = sbr.rel (%p586_p2) target bundleno = 284 (0x11c), region = 74 }
  0x31   : > { %s593_s30 = sshll.u32 %s266_s29, 3 }
  0x32   : > { %s269_s7 = scalar_lea.vmem %s1112_s0, %s593_s30 }
  0x35   : > { %v306_v8 = vld [vmem:[%s1113_s1 + $0xf8] sm:$0xff]  ;;  %v305_v10 = vld [vmem:[%s1113_s1 + $0xf0] sm:$0xff]  ;;  %v304_v12 = vld [vmem:[%s1113_s1 + $0xe8] sm:$0xff]  ;;  %vm380_vm0 = vcmask 519168  }
  0x36   : > { %v290_v9 = vld [vmem:[%s1113_s1 + $0x78] sm:$0xff]  ;;  %594 = vmatprep.subr.mxu0 %v306_v8  ;;  %v289_v11 = vld [vmem:[%s1113_s1 + $0x70] sm:$0xff]  ;;  %v288_v13 = vld [vmem:[%s1113_s1 + $0x68] sm:$0xff] }
  0x37   : > { %595 = vmatpush3.msra.mxu0 %v290_v9  ;;  %v303_v14 = vld [vmem:[%s1113_s1 + $0xe0] sm:$0xff]  ;;  %v302_v16 = vld [vmem:[%s1113_s1 + $0xd8] sm:$0xff]  ;;  %v301_v18 = vld [vmem:[%s1113_s1 + $0xd0] sm:$0xff] }
  0x38   : > { %596 = vmatprep.subr.mxu0 %v305_v10  ;;  %v287_v15 = vld [vmem:[%s1113_s1 + $0x60] sm:$0xff]  ;;  %v286_v17 = vld [vmem:[%s1113_s1 + $0x58] sm:$0xff]  ;;  %v285_v19 = vld [vmem:[%s1113_s1 + $0x50] sm:$0xff] }
  0x39   : > { %597 = vmatpush3.msra.mxu0 %v289_v11  ;;  %v300_v20 = vld [vmem:[%s1113_s1 + $0xc8] sm:$0xff]  ;;  %v274_v21 = vld [vmem:[%s269_s7] sm:$0xff]  ;;  %v298_v26 = vld [vmem:[%s1113_s1 + $0xb8] sm:$0xff] }
  0x3a   : > { %598 = vmatprep.subr.mxu0 %v304_v12  ;;  %v284_v22 = vld [vmem:[%s1113_s1 + $0x48] sm:$0xff]  ;;  %v308_v23 = vcombine.high %v274_v21, %v274_v21  ;;  %v299_v24 = vld [vmem:[%s1113_s1 + $0xc0] sm:$0xff]  ;;  %v282_v27 = vld [vmem:[%s1113_s1 + $0x38] sm:$0xff] }
  0x3b   : > { %599 = vmatpush3.msra.mxu0 %v288_v13  ;;  %v283_v25 = vld [vmem:[%s1113_s1 + $0x40] sm:$0xff]  ;;  %v297_v28 = vld [vmem:[%s1113_s1 + $0xb0] sm:$0xff]  ;;  %v296_v30 = vld [vmem:[%s1113_s1 + $0xa8] sm:$0xff] }
  0x3c   : > { %600 = vmatprep.subr.mxu0 %v303_v14  ;;  %374 = vmatprep.mubr.f32.mxu0 %v308_v23  ;;  %v281_v29 = vld [vmem:[%s1113_s1 + $0x30] sm:$0xff]  ;;  %v280_v31 = vld [vmem:[%s1113_s1 + $0x28] sm:$0xff]  ;;  %v295_v32 = vld [vmem:[%s1113_s1 + $0xa0] sm:$0xff] }
  0x3d   : > { %601 = vmatpush3.msra.mxu0 %v287_v15  ;;  %v279_v33 = vld [vmem:[%s1113_s1 + $0x20] sm:$0xff]  ;;  %v294_v34 = vld [vmem:[%s1113_s1 + $0x98] sm:$0xff]  ;;  %v293_v36 = vld [vmem:[%s1113_s1 + $0x90] sm:$0xff] }
  0x3e   : > { %602 = vmatprep.subr.mxu0 %v302_v16  ;;  %v278_v35 = vld [vmem:[%s1113_s1 + $0x18] sm:$0xff]  ;;  %v277_v37 = vld [vmem:[%s1113_s1 + $0x10] sm:$0xff]  ;;  %v292_v38 = vld [vmem:[%s1113_s1 + $0x88] sm:$0xff] }
  0x3f   : > { %603 = vmatpush3.msra.mxu0 %v286_v17  ;;  %v276_v39 = vld [vmem:[%s1113_s1 + $0x8] sm:$0xff]  ;;  %v291_v40 = vld [vmem:[%s1113_s1 + $0x80] sm:$0xff] }
  0x40   : > { %604 = vmatprep.subr.mxu0 %v301_v18  ;;  %v275_v41 = vld [vmem:[%s1113_s1] sm:$0xff] }
  0x41   : > { %605 = vmatpush3.msra.mxu0 %v285_v19 }
  0x42   : > { %606 = vmatprep.subr.mxu0 %v300_v20 }
  0x43   : > { %607 = vmatpush3.msra.mxu0 %v284_v22 }
  0x44   : > { %608 = vmatprep.subr.mxu0 %v299_v24 }
  0x45   : > { %609 = vmatpush3.msra.mxu0 %v283_v25 }
  0x46   : > { %610 = vmatprep.subr.mxu0 %v298_v26 }
  0x47   : > { %611 = vmatpush3.msra.mxu0 %v282_v27 }
  0x48   : > { %612 = vmatprep.subr.mxu0 %v297_v28 }
  0x49   : > { %613 = vmatpush3.msra.mxu0 %v281_v29 }
  0x4a   : > { %614 = vmatprep.subr.mxu0 %v296_v30 }
  0x4b   : > { %615 = vmatpush3.msra.mxu0 %v280_v31 }
  0x4c   : > { %616 = vmatprep.subr.mxu0 %v295_v32 }
  0x4d   : > { %617 = vmatpush3.msra.mxu0 %v279_v33 }
  0x4e   : > { %618 = vmatprep.subr.mxu0 %v294_v34 }
  0x4f   : > { %619 = vmatpush3.msra.mxu0 %v278_v35 }
  0x50   : > { %620 = vmatprep.subr.mxu0 %v293_v36 }
  0x51   : > { %621 = vmatpush3.msra.mxu0 %v277_v37 }
  0x52   : > { %622 = vmatprep.subr.mxu0 %v292_v38 }
  0x53   : > { %623 = vmatpush3.msra.mxu0 %v276_v39 }
  0x54   : > { %624 = vmatprep.subr.mxu0 %v291_v40 }
  0x55   : > { %625 = vmatpush3.msra.mxu0 %v275_v41 }
  0x56   : > { %375 = vmatmul.mubr.f32.vlgmr.msra.gmra.mxu0 %v274_v21 }
 0x116   : > { %v626_v42 = vpop.f32.mrf.mxu0 }
 0x118   : > { %v627_v43 = vpop.f32.mrf.mxu0 }
 0x119   : > { %v628_v44 = vadd.f32 %v627_v43, %v626_v42 }
 0x11b   : > { %381 = vst.msk [vmem:[#allocation2] sm:$0xf] %vm380_vm0, %v628_v44 }
 0x11c PF: > { %v390_v45 = vld [vmem:[%s943_s8 + $0x38] sm:$0xff]  ;;  %v825_v46 = vmov 0.0   ;;  %v389_v47 = vld [vmem:[%s943_s8 + $0x30] sm:$0xff]  ;;  %vm826_vm1 = vmmov 0   ;;  %v388_v48 = vld [vmem:[%s943_s8 + $0x28] sm:$0xff]  ;;  %vm391_vm2 = vcmask 523264  }
 0x11d   : > { %638 = vmatprep.subr.mxu0 %v825_v46  ;;  %654 = vmatprep.mubr.msk.f32.mxu0 %vm826_vm1, %v825_v46  ;;  %v387_v49 = vld [vmem:[%s943_s8 + $0x20] sm:$0xff]  ;;  %v386_v50 = vld [vmem:[%s943_s8 + $0x18] sm:$0xff]  ;;  %v385_v51 = vld [vmem:[%s943_s8 + $0x10] sm:$0xff]  ;;  %s589_s25 = sshll.u32 %s811_s16, 1  ;;  %s482_s5 = sshll.u32 %s945_s9, 4  ;;  %s1060_s5 = int_to_ptr.vmem [resolvable:$true] %s482_s5 }
 0x11e   : > { %639 = vmatpush3.msra.mxu0 %v390_v45  ;;  %v384_v52 = vld [vmem:[%s943_s8 + $0x8] sm:$0xff]  ;;  %v383_v53 = vld [vmem:[%s943_s8] sm:$0xff]  ;;  %s478_s30 = sadd.s32 %s807_s15, %s589_s25  ;;  %s467_s8 = scalar_lea.sflag [#allocation5], %s934_s24 }
 0x11f   : > { %640 = vmatprep.subr.mxu0 %v825_v46  ;;  %s590_s28 = sshll.u32 %s478_s30, 6  ;;  %s731_s11 = scalar_lea.vmem %s1060_s5, 64 }
 0x120   : > { %641 = vmatpush3.msra.mxu0 %v389_v47  ;;  %s1058_s10 = scalar_lea.hbm %s1115_s3, %s590_s28  ;;  %p732_p3 = scmp.ne.s32.totalorder %s1060_s5, %s731_s11 }
 0x121   : > { %642 = vmatprep.subr.mxu0 %v825_v46  ;;  %s827_s15 = smov [#allocation4]  }
 0x122   : > { %643 = vmatpush3.msra.mxu0 %v388_v48  ;;  %v382_v54 = vld [vmem:[#allocation2] sm:$0xf]  ;;  %p733_p4 = pnand %p732_p3, %p908_p8  ;;  %s735_s16 = sshll.u32 %s827_s15, 4  ;;  %s736_s16 = int_to_ptr.vmem [resolvable:$false] %s735_s16 }
 0x123   : > { %644 = vmatprep.subr.mxu0 %v825_v46  ;;  %s737_s20 = scalar_lea.vmem %s736_s16, 128  ;;  %p738_p6 = scmp.lt.s32.totalorder %s1060_s5, %s736_s16 }
 0x124   : > { %645 = vmatpush3.msra.mxu0 %v387_v49  ;;  %p734_p5 = pneg %p733_p4  ;;  %p739_p7 = scmp.lt.s32.totalorder %s737_s20, %s731_s11 }
 0x125   : > { %646 = vmatprep.subr.mxu0 %v825_v46 }
 0x126   : > { %647 = vmatpush3.msra.mxu0 %v386_v50  ;;  %p740_p10 = por %p739_p7, %p738_p6 }
 0x127   : > { %648 = vmatprep.subr.mxu0 %v825_v46 }
 0x128   : > { %649 = vmatpush3.msra.mxu0 %v385_v51  ;;  %p741_p11 = pnand %p740_p10, %p734_p5 }
 0x129   : > { %650 = vmatprep.subr.mxu0 %v825_v46 }
 0x12a   : > { %651 = vmatpush3.msra.mxu0 %v384_v52 }
 0x12b   : > { %652 = vmatprep.subr.mxu0 %v825_v46 }
 0x12c   : > { %653 = vmatpush3.msra.mxu0 %v383_v53 }
 0x12d   : > { %655 = vmatmul.mubr.msk.f32.vlgmr.msra.gmra.mxu0 %vm391_vm2, %v382_v54 }
 0x1ed   : > { %v461_v55 = vpop.f32.mrf.mxu0 }
 0x1ee   : > { %465 = vst [vmem:[%s945_s9] sm:$0xf] %v461_v55 }
 0x1ef   : > { %v656_v56 = vpop.f32.mrf.mxu0 }
 0x1f0   : > { %744 = shalt.err (!%p741_p11)
}
 0x1f1   : > { %s745_s9 = scalar_lea.hbm %s1058_s10, 64  ;;  %s749_s21 = scalar_lea.hbm %s1115_s3, 256 }
 0x1f2   : > { %p746_p12 = scmp.ne.s32.totalorder %s1058_s10, %s745_s9  ;;  %p750_p1 = scmp.lt.s32.totalorder %s1058_s10, %s1115_s3 }
 0x1f3   : > { %p751_p2 = scmp.lt.s32.totalorder %s749_s21, %s745_s9 }
 0x1f4   : > { %p747_p13 = pnand %p746_p12, %p908_p8 }
 0x1f5   : > { %p752_p3 = por %p751_p2, %p750_p1 }
 0x1f6   : > { %p748_p0 = pneg %p747_p13 }
 0x1f8   : > { %p753_p4 = pnand %p752_p3, %p748_p0 }
 0x1fa   : > { %756 = shalt.err (!%p753_p4)
}
 0x1fb   : > { %657 = dma.vmem_to_hbm [thread:$0]  (%p908_p8), %s1060_s5, 64, %s1058_s10, %s467_s8  }
 0x1fc PF: > { %p663_p5 = scmp.ge.s32.totalorder %s823_s19, 2  ;;  %s494_s30 = sand.u32 1, %s795_s12  }
 0x1fd   : > { %s495_s28 = scalar_lea.sflag [#allocation5], %s494_s30 }
 0x1fe   : > { %p660_p6 = pnand %p663_p5, %p912_p9 }
 0x200   : > { %p661_p7 = pneg %p660_p6 }
 0x202   : > { %790 = dma.done.wait (%p661_p7), %s495_s28, 64  }
 0x203   : > { %792 = vsyncadd (%p661_p7), %s495_s28, 4294967232  ;;  %s16_s19 = sadd.s32 1, %s823_s19   ;;  %s1121_s12 = smov %s799_s13 }
 0x204   : > { %p13_p10 = scmp.ge.s32.totalorder %s16_s19, 6   ;;  %s1122_s13 = smov %s803_s14 }
 0x205   : > { %s1123_s14 = smov %s920_s4  ;;  %s1124_s15 = smov %s815_s17 }
 0x206   : > { %s1125_s16 = smov %s819_s18  ;;  %s1126_s17 = smov %s1129_s22 }
 0x207   : > { %s1127_s18 = smov %s1133_s23  ;;  %15 = sbr.rel (!%p13_p10) target bundleno = 7 (0x7), region = 117 }
 0x20c   :  { %500 = vsyncpa [#allocation5], 1 }
 0x20d   :  { %502 = vsyncpa [#allocation5 + $0x1], 1 }

</bundles_post_ra>
